<compile_context>
chip_gen: v6e
topology: v6e:2x2x1
jax: 0.10.0
libtpu: 0.0.40
codegen_flags: <defaults>
</compile_context>

<pallas_src>
from functools import partial

import jax
import jax.numpy as jnp
from jax.experimental import pallas as pl
from jax.experimental.pallas import tpu as pltpu

GAMMA = 4
ALPHA = 2

LANES = 128            # vreg lane width (last dim of every block)
MAX_BLOCK_ROWS = 4096  # (4096, 128) f32 = 2 MiB per input per buffer
NUM_SHARDS = 2         # leading "parallel" grid axis (megacore on v7x)


def _int_pow(x, k):
    """x ** k for non-negative integer k via repeated multiplies (VPU only)."""
    k = int(k)
    if k == 0:
        return jnp.ones_like(x)
    result = None
    while True:
        if k & 1:
            result = x if result is None else result * x
        k >>= 1
        if k == 0:
            break                      # no dead trailing square
        x = x * x
    return result


def _focal_block(p, t, gamma, alpha):
    """Element-wise focal loss of one block (pure VPU + one EUP log)."""
    p = p.astype(jnp.float32)
    is_pos = t == jnp.ones((), dtype=t.dtype)
    p_t = jnp.where(is_pos, p, 1.0 - p)
    q = 1.0 - p_t
    if float(gamma) == int(gamma):
        qg = _int_pow(q, int(gamma))           # VPU multiplies only
    else:
        qg = q ** jnp.float32(gamma)           # non-integer gamma fallback
    # Fold the leading minus sign and alpha into a single select.
    scale = jnp.where(is_pos, jnp.float32(-float(alpha)), jnp.float32(-1.0))
    # TODO(synk): log(p_t) is intentionally unguarded (pred==0/1 -> inf/nan),
    # matching the PyTorch focal_loss reference.
    return qg * jnp.log(p_t) * scale


def _focal_sum_kernel(pred_ref, gt_ref, out_ref, acc_ref, *,
                      gamma, alpha, block_rows, valid_rows, shard_steps,
                      full_blocks, needs_mask):
    """Accumulates the focal-loss partial sums for one shard of row-blocks.

    Grid: (shard, reduction_step) = ("parallel", "arbitrary").  The accumulator
    is a single (8, LANES) f32 VMEM tile; every block is first reduced with
    tile-aligned vreg adds, so the cross-lane reduction never runs in-kernel.
    """
    c = pl.program_id(0)          # shard (parallel axis)
    i = pl.program_id(1)          # reduction step (arbitrary axis)

    @pl.when(i == 0)
    def _init():
        acc_ref[...] = jnp.zeros_like(acc_ref)

    fl = _focal_block(pred_ref[...], gt_ref[...], gamma, alpha)

    groups = block_rows // 8
    reduced = fl.reshape(groups, 8, LANES).sum(axis=0)   # vreg-vs-vreg adds

    if needs_mask:
        blk = c * shard_steps + i
        # Interior blocks: no mask work at all.
        @pl.when(blk < full_blocks)
        def _interior():
            acc_ref[...] += reduced

        # Boundary blocks: the partial last block and clamped shard-overflow
        # duplicates.  row_ids uses the UNCLAMPED block id, so overflow steps
        # (blk > last real block) are masked to zero entirely.
        @pl.when(blk >= full_blocks)
        def _boundary():
            row_ids = (blk * block_rows
                       + jax.lax.broadcasted_iota(jnp.int32, fl.shape, 0))
            masked = jnp.where(row_ids < valid_rows, fl, 0.0)
            acc_ref[...] += masked.reshape(groups, 8, LANES).sum(axis=0)
    else:
        acc_ref[...] += reduced

    @pl.when(i == pl.num_programs(1) - 1)
    def _finalize():
        out_ref[...] = acc_ref[...][None, :, :]


def _focal_elems_jnp(p, t, gamma, alpha):
    """Plain-jnp per-element focal loss (ragged-tail / tiny-input path)."""
    p = p.astype(jnp.float32)
    is_pos = t == jnp.ones((), dtype=t.dtype)
    p_t = jnp.where(is_pos, p, 1.0 - p)
    fl = -((1.0 - p_t) ** gamma) * jnp.log(p_t)
    return jnp.where(is_pos, fl * alpha, fl)


def org_focal_loss(pred, gt, gamma=GAMMA, alpha=ALPHA,
                   max_block_rows=MAX_BLOCK_ROWS):
    """Pallas TPU implementation of ORGFocalLoss.forward(pred, gt).

    Caller contract: ship `gt` in a narrow dtype (bool/int8/bf16) when you can
    — the kernel is gt-dtype agnostic and never casts labels in HBM.
    """
    n = pred.size
    flat_p = pred.reshape(-1)
    flat_t = gt.reshape(-1)          # keep caller dtype; no f32 cast here

    rem = n % LANES
    n_main = n - rem
    rows = n_main // LANES

    tail_sum = jnp.float32(0.0)
    if rem:
        # Ragged (<128-element) lane tail summed in plain jnp; the kernel only
        # ever sees lane-aligned data (no full-array jnp.pad copy).
        tail_sum = jnp.sum(
            _focal_elems_jnp(flat_p[n_main:], flat_t[n_main:], gamma, alpha))

    if rows < 8:
        # Tiny input (< 1024 kernel-eligible elements): not worth a launch.
        main_sum = jnp.float32(0.0)
        if rows:
            main_sum = jnp.sum(
                _focal_elems_jnp(flat_p[:n_main], flat_t[:n_main], gamma, alpha))
        return (main_sum + tail_sum) / n

    p2 = (flat_p[:n_main] if rem else flat_p).reshape(rows, LANES)
    t2 = (flat_t[:n_main] if rem else flat_t).reshape(rows, LANES)

    # block_rows must be a multiple of 8 so the (8, LANES) regroup is a free,
    # tile-aligned reshape.
    mbr = max(8, (int(max_block_rows) // 8) * 8)
    block_rows = min(mbr, (rows // 8) * 8)
    total_blocks = -(-rows // block_rows)
    num_shards = NUM_SHARDS if total_blocks >= NUM_SHARDS else 1
    shard_steps = -(-total_blocks // num_shards)
    last_block = total_blocks - 1
    full_blocks = rows // block_rows          # blocks with every row valid
    needs_mask = (full_blocks != total_blocks) or \
                 (num_shards * shard_steps != total_blocks)

    def in_map(c, i):
        blk = c * shard_steps + i
        # Clamp overflow steps onto the last real block; their contribution is
        # fully masked inside the kernel, so re-reading it is safe.
        return (jnp.minimum(blk, last_block), 0)

    if shard_steps >= 3:
        in_spec = pl.BlockSpec((block_rows, LANES), in_map,
                               pipeline_mode=pl.Buffered(3))
    else:
        in_spec = pl.BlockSpec((block_rows, LANES), in_map)

    kernel = partial(_focal_sum_kernel, gamma=gamma, alpha=alpha,
                     block_rows=block_rows, valid_rows=rows,
                     shard_steps=shard_steps, full_blocks=full_blocks,
                     needs_mask=needs_mask)

    in_bytes = (p2.size * p2.dtype.itemsize) + (t2.size * t2.dtype.itemsize)
    out_bytes = num_shards * 8 * LANES * 4
    cost = pl.CostEstimate(flops=10 * n, transcendentals=n,
                           bytes_accessed=in_bytes + out_bytes)

    out = pl.pallas_call(
        kernel,
        out_shape=jax.ShapeDtypeStruct((num_shards, 8, LANES), jnp.float32),
        grid_spec=pltpu.PrefetchScalarGridSpec(
            num_scalar_prefetch=0,
            grid=(num_shards, shard_steps),
            in_specs=[in_spec, in_spec],
            out_specs=pl.BlockSpec((1, 8, LANES), lambda c, i: (c, 0, 0)),
            scratch_shapes=[pltpu.VMEM((8, LANES), jnp.float32)],
        ),
        compiler_params=pltpu.CompilerParams(
            dimension_semantics=("parallel", "arbitrary"),
            vmem_limit_bytes=32 * 1024 * 1024),
        cost_estimate=cost,
    )(p2, t2)

    # Each shard's (8, LANES) slab holds per-position partial sums; one tiny
    # jnp reduce finishes the job.
    total = jnp.sum(out) + tail_sum
    return total / n


def _ref_focal_loss(pred, gt, gamma=GAMMA, alpha=ALPHA):
    """Pure-JAX reference mirroring the PyTorch module."""
    pred = pred.astype(jnp.float32)
    gt = gt.astype(jnp.float32)
    is_pos = gt == 1.0
    p_t = jnp.where(is_pos, pred, 1.0 - pred)
    fl = -((1.0 - p_t) ** gamma) * jnp.log(p_t)
    fl = jnp.where(is_pos, fl * alpha, fl)
    return jnp.mean(fl)


if __name__ == "__main__":
    key = jax.random.PRNGKey(0)
    keys = jax.random.split(key, 10)

    # Primary: NCHW, batch=2, channels=4, spatial=16x16 (lane-aligned).
    shape = (2, 4, 16, 16)
    pred = jax.nn.sigmoid(jax.random.normal(keys[0], shape, dtype=jnp.float32))
    gt = jax.random.bernoulli(keys[1], 0.3, shape).astype(jnp.float32)

    loss = jax.block_until_ready(org_focal_loss(pred, gt))
    ref = _ref_focal_loss(pred, gt)
    assert jnp.allclose(loss, ref, rtol=1e-5, atol=1e-6), (loss, ref)

    # gt shipped as int8 (recommended narrow-dtype path) gives the same answer.
    loss_i8 = jax.block_until_ready(org_focal_loss(pred, gt.astype(jnp.int8)))
    assert jnp.allclose(loss_i8, ref, rtol=1e-5, atol=1e-6), (loss_i8, ref)

    # Multi-block / 2-shard / partial-last-block + overflow-mask path.
    shape2 = (2, 4, 16, 20)
    pred2 = jax.nn.sigmoid(jax.random.normal(keys[2], shape2, dtype=jnp.float32))
    gt2 = jax.random.bernoulli(keys[3], 0.3, shape2).astype(jnp.float32)
    loss2 = jax.block_until_ready(org_focal_loss(pred2, gt2, max_block_rows=8))
    ref2 = _ref_focal_loss(pred2, gt2)
    assert jnp.allclose(loss2, ref2, rtol=1e-5, atol=1e-6), (loss2, ref2)

    # Many interior blocks: exercises Buffered(3) + maskless fast path.
    shape4 = (4, 4, 32, 32)
    pred4 = jax.nn.sigmoid(jax.random.normal(keys[4], shape4, dtype=jnp.float32))
    gt4 = jax.random.bernoulli(keys[5], 0.3, shape4).astype(jnp.int8)
    loss4 = jax.block_until_ready(org_focal_loss(pred4, gt4, max_block_rows=8))
    ref4 = _ref_focal_loss(pred4, gt4)
    assert jnp.allclose(loss4, ref4, rtol=1e-5, atol=1e-6), (loss4, ref4)

    # Lane-unaligned element count: ragged tail in plain jnp + masked boundary.
    shape3 = (3, 5, 7, 11)
    pred3 = jax.nn.sigmoid(jax.random.normal(keys[6], shape3, dtype=jnp.float32))
    gt3 = jax.random.bernoulli(keys[7], 0.3, shape3).astype(jnp.float32)
    loss3 = jax.block_until_ready(org_focal_loss(pred3, gt3))
    ref3 = _ref_focal_loss(pred3, gt3)
    assert jnp.allclose(loss3, ref3, rtol=1e-5, atol=1e-6), (loss3, ref3)

    # Tiny input: pure-jnp fallback path.
    shape5 = (2, 3, 5, 7)
    pred5 = jax.nn.sigmoid(jax.random.normal(keys[8], shape5, dtype=jnp.float32))
    gt5 = jax.random.bernoulli(keys[9], 0.3, shape5).astype(jnp.float32)
    loss5 = jax.block_until_ready(org_focal_loss(pred5, gt5))
    ref5 = _ref_focal_loss(pred5, gt5)
    assert jnp.allclose(loss5, ref5, rtol=1e-5, atol=1e-6), (loss5, ref5)

    print("KERNEL_OK")
</pallas_src>

<mosaic_0001>
module attributes {stable_mosaic.version = 11 : i64} {
  func.func @_focal_sum_kernel(%arg0: i32, %arg1: i32, %arg2: memref<16x128xf32, #tpu.memory_space<vmem>>, %arg3: memref<16x128xf32, #tpu.memory_space<vmem>>, %arg4: memref<1x8x128xf32, #tpu.memory_space<vmem>>, %arg5: memref<8x128xf32, #tpu.memory_space<vmem>>) attributes {dimension_semantics = [#tpu.dimension_semantics<parallel>, #tpu.dimension_semantics<arbitrary>], iteration_bounds = array<i64: 1, 1>, scalar_prefetch = 0 : i64, scratch_operands = 1 : i64, tpu.core_type = #tpu.core_type<tc>, window_params = [{transform_indices = @transform_0, window_bounds = array<i64: 16, 128>}, {transform_indices = @transform_1, window_bounds = array<i64: 16, 128>}, {transform_indices = @transform_2, window_bounds = array<i64: 1, 8, 128>}]} {
    %c0_i32 = arith.constant 0 : i32
    %0 = arith.cmpi eq, %arg1, %c0_i32 : i32
    %1 = arith.extui %0 : i1 to i32
    %c0_i32_0 = arith.constant 0 : i32
    %2 = arith.cmpi ne, %1, %c0_i32_0 : i32
    scf.if %2 {
      %cst_15 = arith.constant 0.000000e+00 : f32
      %28 = vector.broadcast %cst_15 : f32 to vector<8x128xf32>
      %c0_16 = arith.constant 0 : index
      %c0_17 = arith.constant 0 : index
      %29 = vector.load %arg5[%c0_16, %c0_17] : memref<8x128xf32, #tpu.memory_space<vmem>>, vector<8x128xf32>
      tpu.vector_store %arg5[%c0_16, %c0_17], %28 {strides = array<i32>} : memref<8x128xf32, #tpu.memory_space<vmem>>, vector<8x128xf32>,
    } else {
    }
    %c0 = arith.constant 0 : index
    %c0_1 = arith.constant 0 : index
    %3 = vector.load %arg2[%c0, %c0_1] : memref<16x128xf32, #tpu.memory_space<vmem>>, vector<16x128xf32>
    %c0_2 = arith.constant 0 : index
    %c0_3 = arith.constant 0 : index
    %4 = vector.load %arg3[%c0_2, %c0_3] : memref<16x128xf32, #tpu.memory_space<vmem>>, vector<16x128xf32>
    %cst = arith.constant 1.000000e+00 : f32
    %5 = vector.broadcast %cst : f32 to vector<16x128xf32>
    %6 = arith.cmpf oeq, %4, %5 : vector<16x128xf32>
    %cst_4 = arith.constant 1.000000e+00 : f32
    %7 = vector.broadcast %cst_4 : f32 to vector<16x128xf32>
    %8 = arith.subf %7, %3 : vector<16x128xf32>
    %9 = arith.select %6, %3, %8 : vector<16x128xi1>, vector<16x128xf32>
    %cst_5 = arith.constant 1.000000e+00 : f32
    %10 = vector.broadcast %cst_5 : f32 to vector<16x128xf32>
    %11 = arith.subf %10, %9 : vector<16x128xf32>
    %12 = arith.mulf %11, %11 : vector<16x128xf32>
    %13 = arith.mulf %12, %12 : vector<16x128xf32>
    %cst_6 = arith.constant -2.000000e+00 : f32
    %cst_7 = arith.constant -1.000000e+00 : f32
    %14 = vector.broadcast %cst_6 : f32 to vector<16x128xf32>
    %15 = vector.broadcast %cst_7 : f32 to vector<16x128xf32>
    %16 = arith.select %6, %14, %15 : vector<16x128xi1>, vector<16x128xf32>
    %17 = math.log %9 : vector<16x128xf32>
    %18 = arith.mulf %13, %17 : vector<16x128xf32>
    %19 = arith.mulf %18, %16 : vector<16x128xf32>
    %20 = vector.shape_cast %19 : vector<16x128xf32> to vector<2x8x128xf32>
    %cst_8 = arith.constant dense<0.000000e+00> : vector<8x128xf32>
    %21 = vector.multi_reduction <add>, %20, %cst_8 [0] : vector<2x8x128xf32> to vector<8x128xf32>
    %c0_9 = arith.constant 0 : index
    %c0_10 = arith.constant 0 : index
    %22 = vector.load %arg5[%c0_9, %c0_10] : memref<8x128xf32, #tpu.memory_space<vmem>>, vector<8x128xf32>
    %23 = arith.addf %22, %21 : vector<8x128xf32>
    %c0_11 = arith.constant 0 : index
    %c0_12 = arith.constant 0 : index
    %24 = vector.load %arg5[%c0_11, %c0_12] : memref<8x128xf32, #tpu.memory_space<vmem>>, vector<8x128xf32>
    tpu.vector_store %arg5[%c0_11, %c0_12], %23 {strides = array<i32>} : memref<8x128xf32, #tpu.memory_space<vmem>>, vector<8x128xf32>,
    %c0_i32_13 = arith.constant 0 : i32
    %25 = arith.cmpi eq, %arg1, %c0_i32_13 : i32
    %26 = arith.extui %25 : i1 to i32
    %c0_i32_14 = arith.constant 0 : i32
    %27 = arith.cmpi ne, %26, %c0_i32_14 : i32
    scf.if %27 {
      %c0_15 = arith.constant 0 : index
      %c0_16 = arith.constant 0 : index
      %28 = vector.load %arg5[%c0_15, %c0_16] : memref<8x128xf32, #tpu.memory_space<vmem>>, vector<8x128xf32>
      %29 = vector.shape_cast %28 : vector<8x128xf32> to vector<1x8x128xf32>
      %c0_17 = arith.constant 0 : index
      %c0_18 = arith.constant 0 : index
      %c0_19 = arith.constant 0 : index
      %30 = vector.load %arg4[%c0_17, %c0_18, %c0_19] : memref<1x8x128xf32, #tpu.memory_space<vmem>>, vector<1x8x128xf32>
      tpu.vector_store %arg4[%c0_17, %c0_18, %c0_19], %29 {strides = array<i32>} : memref<1x8x128xf32, #tpu.memory_space<vmem>>, vector<1x8x128xf32>,
    } else {
    }
    return
  }
  func.func @transform_0(%arg0: i32, %arg1: i32) -> (i32, i32) {
    %c1_i32 = arith.constant 1 : i32
    %0 = arith.muli %arg0, %c1_i32 : i32
    %1 = arith.addi %0, %arg1 : i32
    %c0_i32 = arith.constant 0 : i32
    %2 = arith.minsi %1, %c0_i32 : i32
    %c0_i32_0 = arith.constant 0 : i32
    %c0_i32_1 = arith.constant 0 : i32
    return %2, %c0_i32_0 : i32, i32
  }
  func.func @transform_1(%arg0: i32, %arg1: i32) -> (i32, i32) {
    %c1_i32 = arith.constant 1 : i32
    %0 = arith.muli %arg0, %c1_i32 : i32
    %1 = arith.addi %0, %arg1 : i32
    %c0_i32 = arith.constant 0 : i32
    %2 = arith.minsi %1, %c0_i32 : i32
    %c0_i32_0 = arith.constant 0 : i32
    %c0_i32_1 = arith.constant 0 : i32
    return %2, %c0_i32_0 : i32, i32
  }
  func.func @transform_2(%arg0: i32, %arg1: i32) -> (i32, i32, i32) {
    %c0_i32 = arith.constant 0 : i32
    %c0_i32_0 = arith.constant 0 : i32
    %c0_i32_1 = arith.constant 0 : i32
    return %arg0, %c0_i32, %c0_i32_0 : i32, i32, i32
  }
}

</mosaic_0001>

<bundles_post_ra>
// kernel: tpu_custom_call.1
= control target key start
LH: loop header
LB: loop body
LE: loop exit
PB: predicated region body
PF: predicated region fallthrough
CT: control target
= control target key end

     0   :  { %7 = vsyncpa [#allocation4], 0  ;;  %s230_s0 = inlined_call_operand.hbm [shape: f32[16,128], index: 0, kind: input, shape index: {}]   ;;  %s231_s1 = inlined_call_operand.hbm [shape: f32[16,128], index: 1, kind: input, shape index: {}]   ;;  %s232_s2 = inlined_call_operand.hbm [shape: f32[1,8,128], index: 2, kind: output, shape index: {}]  }
   0x1   :  { %8 = vsyncpa [#allocation7], 0 }
   0x2   :  { %9 = vsyncpa [#allocation5], 0  ;;  %s196_s9 = smov [#allocation3]  }
   0x3   :  { %s21_s10 = sshll.u32 %s196_s9, 4  ;;  %s22_s10 = int_to_ptr.vmem [resolvable:$true] %s21_s10 }
   0x4   :  { %s138_s11 = scalar_lea.vmem %s22_s10, 256  ;;  %p143_p1 = scmp.lt.s32.totalorder %s22_s10, %s22_s10 }
   0x5   :  { %p139_p0 = scmp.ne.s32.totalorder %s22_s10, %s138_s11  ;;  %p144_p2 = scmp.lt.s32.totalorder %s138_s11, %s138_s11 }
   0x7   :  { %p145_p3 = por %p144_p2, %p143_p1 }
   0x9   :  { %p146_p4 = pnand %p145_p3, %p139_p0 }
   0xb   :  { %149 = shalt.err (!%p146_p4)
}
   0xc   :  { %s197_s12 = smov 128   ;;  %s198_s13 = smov 8  }
   0xd   :  { %27 = dma.hbm_to_vmem [thread:$0]  %s230_s0, 256, %s22_s10, [#allocation4], %s197_s12, %s197_s12, %s198_s13  }
   0xe   :  { %s199_s16 = smov [#allocation6]  }
   0xf   :  { %s39_s17 = sshll.u32 %s199_s16, 4  ;;  %s40_s17 = int_to_ptr.vmem [resolvable:$true] %s39_s17 }
  0x10   :  { %s158_s18 = scalar_lea.vmem %s40_s17, 256  ;;  %p163_p6 = scmp.lt.s32.totalorder %s40_s17, %s40_s17 }
  0x11   :  { %p159_p5 = scmp.ne.s32.totalorder %s40_s17, %s158_s18  ;;  %p164_p7 = scmp.lt.s32.totalorder %s158_s18, %s158_s18 }
  0x13   :  { %p165_p8 = por %p164_p7, %p163_p6 }
  0x15   :  { %p166_p9 = pnand %p165_p8, %p159_p5 }
  0x17   :  { %169 = shalt.err (!%p166_p9)
}
  0x18   :  { %45 = dma.hbm_to_vmem [thread:$0]  %s231_s1, 256, %s40_s17, [#allocation7], %s197_s12, %s197_s12, %s198_s13  }
  0x19   :  { %190 = dma.done.wait [#allocation4], 256  }
  0x1a   :  { %191 = vsyncadd [#allocation4], 4294967040 }
  0x1b   :  { %192 = dma.done.wait [#allocation7], 256  }
  0x1c   :  { %193 = vsyncadd [#allocation7], 4294967040  ;;  %v65_v0 = vld [vmem:[#allocation3] sm:$0xff]  ;;  %v66_v1 = vld [vmem:[#allocation3 + $0x8] sm:$0xff]  ;;  %v200_v17 = vmov -1.0   ;;  %s201_s0 = smov [#allocation8]  }
  0x1d   :  { %v67_v2 = vld [vmem:[#allocation6] sm:$0xff]  ;;  %v68_v3 = vld [vmem:[#allocation6 + $0x8] sm:$0xff]  ;;  %v71_v4 = vsub.f32 1.0, %v65_v0  ;;  %v72_v5 = vsub.f32 1.0, %v66_v1  ;;  %s106_s1 = sshll.u32 %s201_s0, 4  ;;  %s107_s1 = int_to_ptr.vmem [resolvable:$true] %s106_s1 }
  0x1e   :  { %vm69_vm0 = vcmp.eq.f32.partialorder %v67_v2, 1.0  ;;  %vm70_vm1 = vcmp.eq.f32.partialorder %v68_v3, 1.0  ;;  %s170_s21 = scalar_lea.vmem %s107_s1, 128  ;;  %p175_p11 = scmp.lt.s32.totalorder %s107_s1, %s107_s1 }
  0x1f   :  { %v73_v6 = vsel %vm69_vm0, %v65_v0, %v71_v4  ;;  %v74_v7 = vsel %vm70_vm1, %v66_v1, %v72_v5  ;;  %v81_v18 = vsel %vm69_vm0, -2.0, %v200_v17  ;;  %v82_v20 = vsel %vm70_vm1, -2.0, %v200_v17  ;;  %p171_p10 = scmp.ne.s32.totalorder %s107_s1, %s170_s21  ;;  %p176_p12 = scmp.lt.s32.totalorder %s170_s21, %s170_s21 }
  0x20   :  { %126 = vlog2.f32 %v73_v6  ;;  %v75_v8 = vsub.f32 1.0, %v73_v6  ;;  %v76_v9 = vsub.f32 1.0, %v74_v7 }
  0x21   :  { %128 = vlog2.f32 %v74_v7  ;;  %p177_p13 = por %p176_p12, %p175_p11 }
  0x22   :  { %v77_v10 = vmul.f32 %v75_v8, %v75_v8  ;;  %v78_v11 = vmul.f32 %v76_v9, %v76_v9 }
  0x23   :  { %p178_p0 = pnand %p177_p13, %p171_p10 }
  0x24   :  { %v79_v12 = vmul.f32 %v77_v10, %v77_v10  ;;  %v80_v14 = vmul.f32 %v78_v11, %v78_v11 }
  0x2d   :  { %v127_v13 = vpop.eup %126 }
  0x2e   :  { %v129_v15 = vpop.eup %128  ;;  %v84_v16 = vmul.f32 0.6931472, %v127_v13 }
  0x2f   :  { %v86_v19 = vmul.f32 0.6931472, %v129_v15 }
  0x30   :  { %v87_v21 = vmul.f32 %v84_v16, %v79_v12 }
  0x31   :  { %v88_v22 = vmul.f32 %v86_v19, %v80_v14 }
  0x32   :  { %v89_v23 = vmul.f32 %v87_v21, %v81_v18 }
  0x33   :  { %v90_v24 = vmul.f32 %v88_v22, %v82_v20 }
  0x35   :  { %v91_v25 = vadd.f32 %v90_v24, %v89_v23 }
  0x37   :  { %99 = vst [vmem:[#allocation8] sm:$0xff] %v91_v25 }
  0x38   :  { %181 = shalt.err (!%p178_p0)
}
  0x39   :  { %109 = dma.vmem_to_hbm [thread:$0]  %s107_s1, 128, %s232_s2, [#allocation5]  }
  0x3a   :  { %194 = dma.done.wait [#allocation5], 128  }
  0x3b   :  { %195 = vsyncadd [#allocation5], 4294967168 }
  0x3c   :  { %113 = vsyncpa [#allocation4], 1 }
  0x3d   :  { %114 = vsyncpa [#allocation7], 1 }
  0x3e   :  { %115 = vsyncpa [#allocation5], 1 }

</bundles_post_ra>
